<compile_context>
chip_gen: v7x
topology: tpu7x:2x2x1
jax: 0.10.0
libtpu: 0.0.40
codegen_flags: <defaults>
</compile_context>

<pallas_src>
import functools

import jax
import jax.numpy as jnp
from jax.experimental import pallas as pl
from jax.experimental.pallas import tpu as pltpu

_LANE = 128
_SUB = 16  # bf16 sublane-tile height


def _round_up(n, m):
    return -(-n // m) * m


def _pow2_bucket(n, lo=8):
    b = lo
    while b < n:
        b *= 2
    return b


# --------------------------------------------------------------------------- #
# Parameter packing
# --------------------------------------------------------------------------- #
def init_params(key, inputdim=4, n_actions=2):
    """PyTorch-nn.Linear-style init; weights stored [in, out] (transposed vs torch)."""
    dims = [(inputdim, 32), (32, 64), (64, 32), (32, n_actions)]
    params = {}
    for idx, (fan_in, fan_out) in enumerate(dims, start=1):
        key, kw, kb = jax.random.split(key, 3)
        bound = 1.0 / jnp.sqrt(jnp.float32(fan_in))
        params[f"w{idx}"] = jax.random.uniform(
            kw, (fan_in, fan_out), jnp.float32, minval=-bound, maxval=bound)
        params[f"b{idx}"] = jax.random.uniform(
            kb, (1, fan_out), jnp.float32, minval=-bound, maxval=bound)
    return params


def pack_params(params):
    """Pack w1..w4 / b1..b4 into wpack[4,128,128] bf16 and bpack[8,128] f32.

    wpack[l] holds layer l+1's weight in its top-left [fan_in, fan_out] corner,
    zero elsewhere (zero padding is what keeps the 128-wide contractions exact,
    see module docstring).  bpack row l = bias of layer l+1, zero-padded lanes.
    """
    inputdim = params["w1"].shape[0]
    n_actions = params["w4"].shape[1]
    assert inputdim <= _LANE and n_actions <= _LANE, "dims must fit in one 128-lane block"

    wpack = jnp.zeros((4, _LANE, _LANE), jnp.bfloat16)
    bpack = jnp.zeros((8, _LANE), jnp.float32)
    for i in range(4):
        w = params[f"w{i + 1}"].astype(jnp.bfloat16)
        kin, kout = w.shape
        wpack = wpack.at[i, :kin, :kout].set(w)
        b = params[f"b{i + 1}"].reshape(-1).astype(jnp.float32)
        bpack = bpack.at[i, :b.shape[0]].set(b)

    return {
        "wpack": wpack,
        "bpack": bpack,
        "inputdim": int(inputdim),
        "pad_in": int(_round_up(max(inputdim, 1), _SUB)),
        "n_actions": int(n_actions),
    }


# --------------------------------------------------------------------------- #
# Kernel
# --------------------------------------------------------------------------- #
def _mlp_kernel(x_ref, wp_ref, bp_ref, out_ref, *, pad_in):
    f32 = jnp.float32
    bf16 = jnp.bfloat16

    xb = x_ref[...].astype(bf16)                                       # [TB, pad_in]

    # fc1 + relu : [TB,pad_in] @ [pad_in,128]  (pad_in is a full bf16 tile height)
    z = jnp.dot(xb, wp_ref[0, :pad_in, :], preferred_element_type=f32)
    z = jnp.maximum(z + bp_ref[0:1, :], 0.0)

    # fc2 + relu : [TB,128] @ [128,128]
    z = jnp.dot(z.astype(bf16), wp_ref[1], preferred_element_type=f32)
    z = jnp.maximum(z + bp_ref[1:2, :], 0.0)

    # fc3 + relu : [TB,128] @ [128,128]
    z = jnp.dot(z.astype(bf16), wp_ref[2], preferred_element_type=f32)
    z = jnp.maximum(z + bp_ref[2:3, :], 0.0)

    # fc4 (no activation) : [TB,128] @ [128,128]; lane-dense full-width store,
    # the wrapper slices the first n_actions lanes.
    z = jnp.dot(z.astype(bf16), wp_ref[3], preferred_element_type=f32)
    out_ref[...] = (z + bp_ref[3:4, :]).astype(out_ref.dtype)


# --------------------------------------------------------------------------- #
# Wrapper
# --------------------------------------------------------------------------- #
def _cost_estimate(b_pad, pad_in):
    flops = 2 * b_pad * _LANE * (pad_in + 3 * _LANE)
    bytes_accessed = (b_pad * pad_in * 4            # x
                      + b_pad * _LANE * 4           # lane-dense out
                      + 4 * _LANE * _LANE * 2       # wpack (bf16)
                      + 8 * _LANE * 4)              # bpack
    return pl.CostEstimate(flops=flops, transcendentals=0,
                           bytes_accessed=bytes_accessed)


def _vmem_limit_bytes(tb, pad_in):
    # double-buffered in/out + ~3 activation temporaries + weights + margin
    x_bytes = tb * pad_in * 4
    out_bytes = tb * _LANE * 4
    w_bytes = 4 * _LANE * _LANE * 2 + 8 * _LANE * 4
    budget = 2 * x_bytes + 2 * out_bytes + 3 * out_bytes + 2 * w_bytes + (2 << 20)
    return int(min(max(budget, 4 << 20), 48 << 20))  # stay well inside v7x's 64 MiB


def cart_model_forward(x, packed, *, tile_b=1024):
    """Forward pass of Cart_model.  x: [B, inputdim] f32 -> [B, n_actions] f32."""
    wpack, bpack = packed["wpack"], packed["bpack"]
    inputdim, pad_in = packed["inputdim"], packed["pad_in"]
    n_actions = packed["n_actions"]

    x = x.astype(jnp.float32)
    B = x.shape[0]
    tile_b = max(8, _round_up(tile_b, 8))

    # ----- batch tile selection (bucketed -> few distinct compiles) -----
    if B <= tile_b:
        tb = _pow2_bucket(B, lo=8)
        if tb >= 1024:
            tb //= 2          # keep >=2 grid steps so v7x's 2 TCs both get work
    else:
        tb = tile_b
    b_pad = _round_up(B, tb)
    n_tiles = b_pad // tb

    # ----- pad batch and feature dims (zeros) -----
    x = jnp.pad(x, ((0, b_pad - B), (0, pad_in - inputdim)))

    kernel = functools.partial(_mlp_kernel, pad_in=pad_in)
    out_shape = jax.ShapeDtypeStruct((b_pad, _LANE), jnp.float32)   # lane-dense
    cost = _cost_estimate(b_pad, pad_in)

    if n_tiles == 1:
        # Tiny batch: no grid, every operand is a single full-extent VMEM block.
        out = pl.pallas_call(
            kernel,
            out_shape=out_shape,
            cost_estimate=cost,
            compiler_params=pltpu.CompilerParams(
                vmem_limit_bytes=_vmem_limit_bytes(tb, pad_in)),
        )(x, wpack, bpack)
    else:
        # Batch-tiled: x / out blocked over B, packed params VMEM-resident
        # (constant index_map), batch axis marked parallel (2 TCs on v7x).
        out = pl.pallas_call(
            kernel,
            out_shape=out_shape,
            grid=(n_tiles,),
            in_specs=[
                pl.BlockSpec((tb, pad_in), lambda i: (i, 0)),
                pl.BlockSpec(wpack.shape, lambda i: (0, 0, 0)),
                pl.BlockSpec(bpack.shape, lambda i: (0, 0)),
            ],
            out_specs=pl.BlockSpec((tb, _LANE), lambda i: (i, 0)),
            cost_estimate=cost,
            compiler_params=pltpu.CompilerParams(
                dimension_semantics=("parallel",),
                vmem_limit_bytes=_vmem_limit_bytes(tb, pad_in)),
        )(x, wpack, bpack)

    return out[:B, :n_actions]


# --------------------------------------------------------------------------- #
# Reference.  Mimics kernel numerics: bf16 MXU inputs, f32 accumulate/elementwise.
# (The kernel is bf16-MXU / f32-accumulate, not f32 end-to-end like PyTorch;
#  for this model the difference is < 2e-3.)
# --------------------------------------------------------------------------- #
def _reference_forward(x, params):
    z = x.astype(jnp.float32)
    for i in range(1, 5):
        w = params[f"w{i}"].astype(jnp.bfloat16)
        b = params[f"b{i}"].astype(jnp.float32)
        z = jnp.dot(z.astype(jnp.bfloat16), w, preferred_element_type=jnp.float32) + b
        if i < 4:
            z = jnp.maximum(z, 0.0)
    return z


if __name__ == "__main__":
    key = jax.random.PRNGKey(0)
    kp, kx1, kx2, kx3 = jax.random.split(key, 4)

    inputdim, n_actions = 4, 2
    params = init_params(kp, inputdim=inputdim, n_actions=n_actions)
    packed = pack_params(params)

    # 1) Small batch -> grid-less single-block path (bucketed to 8).
    x_small = jax.random.normal(kx1, (8, inputdim), dtype=jnp.float32)
    out_small = jax.block_until_ready(cart_model_forward(x_small, packed))
    ref_small = _reference_forward(x_small, params)
    assert out_small.shape == (8, n_actions)
    assert jnp.allclose(out_small, ref_small, atol=2e-3, rtol=2e-3)

    # 2) Acting-style batch of 1 -> bucketed to 8, same compiled kernel shape.
    x_one = jax.random.normal(kx2, (1, inputdim), dtype=jnp.float32)
    out_one = jax.block_until_ready(cart_model_forward(x_one, packed))
    ref_one = _reference_forward(x_one, params)
    assert out_one.shape == (1, n_actions)
    assert jnp.allclose(out_one, ref_one, atol=2e-3, rtol=2e-3)

    # 3) Training-style batch of 1000 -> bucketed to 1024, split into 2 parallel
    #    tiles of 512 (exercises the gridded megacore path).
    x_mid = jax.random.normal(kx3, (1000, inputdim), dtype=jnp.float32)
    out_mid = jax.block_until_ready(cart_model_forward(x_mid, packed))
    ref_mid = _reference_forward(x_mid, params)
    assert out_mid.shape == (1000, n_actions)
    assert jnp.allclose(out_mid, ref_mid, atol=2e-3, rtol=2e-3)

    # 4) Large non-multiple batch -> default tile_b=1024, 3 grid steps (pad 2500->3072).
    x_big = jax.random.normal(kx1, (2500, inputdim), dtype=jnp.float32)
    out_big = jax.block_until_ready(cart_model_forward(x_big, packed))
    ref_big = _reference_forward(x_big, params)
    assert out_big.shape == (2500, n_actions)
    assert jnp.allclose(out_big, ref_big, atol=2e-3, rtol=2e-3)

    print("KERNEL_OK")
</pallas_src>

<mosaic_0001>
module attributes {stable_mosaic.version = 11 : i64} {
  func.func @_mlp_kernel(%arg0: memref<8x16xf32, #tpu.memory_space<vmem>>, %arg1: memref<4x128x128xbf16, #tpu.memory_space<vmem>>, %arg2: memref<8x128xf32, #tpu.memory_space<vmem>>, %arg3: memref<8x128xf32, #tpu.memory_space<vmem>>) attributes {dimension_semantics = [], scalar_prefetch = 0 : i64, scratch_operands = 0 : i64, tpu.core_type = #tpu.core_type<tc>} {
    %c0 = arith.constant 0 : index
    %c0_0 = arith.constant 0 : index
    %0 = vector.load %arg0[%c0, %c0_0] : memref<8x16xf32, #tpu.memory_space<vmem>>, vector<8x16xf32>
    %1 = arith.truncf %0 : vector<8x16xf32> to vector<8x16xbf16>
    %c0_1 = arith.constant 0 : index
    %c0_2 = arith.constant 0 : index
    %c0_3 = arith.constant 0 : index
    %2 = vector.load %arg1[%c0_1, %c0_2, %c0_3] : memref<4x128x128xbf16, #tpu.memory_space<vmem>>, vector<1x16x128xbf16>
    %3 = vector.shape_cast %2 : vector<1x16x128xbf16> to vector<16x128xbf16>
    %cst = arith.constant dense<0.000000e+00> : vector<8x128xf32>
    %4 = tpu.matmul %1, %3, %cst {dimension_numbers = #tpu.dot_dimension_numbers<[1], [0], [0], [1], [0, 0, 1, 1], [], []>} : vector<8x16xbf16>, vector<16x128xbf16>, vector<8x128xf32> -> vector<8x128xf32>
    %c0_4 = arith.constant 0 : index
    %c0_5 = arith.constant 0 : index
    %5 = vector.load %arg2[%c0_4, %c0_5] : memref<8x128xf32, #tpu.memory_space<vmem>>, vector<1x128xf32>
    %6 = vector.broadcast %5 : vector<1x128xf32> to vector<8x128xf32>
    %7 = arith.addf %4, %6 : vector<8x128xf32>
    %cst_6 = arith.constant 0.000000e+00 : f32
    %8 = vector.broadcast %cst_6 : f32 to vector<8x128xf32>
    %9 = arith.maximumf %7, %8 : vector<8x128xf32>
    %10 = arith.truncf %9 : vector<8x128xf32> to vector<8x128xbf16>
    %c1 = arith.constant 1 : index
    %c0_7 = arith.constant 0 : index
    %c0_8 = arith.constant 0 : index
    %11 = vector.load %arg1[%c1, %c0_7, %c0_8] : memref<4x128x128xbf16, #tpu.memory_space<vmem>>, vector<1x128x128xbf16>
    %12 = vector.shape_cast %11 : vector<1x128x128xbf16> to vector<128x128xbf16>
    %cst_9 = arith.constant dense<0.000000e+00> : vector<8x128xf32>
    %13 = tpu.matmul %10, %12, %cst_9 {dimension_numbers = #tpu.dot_dimension_numbers<[1], [0], [0], [1], [0, 0, 1, 1], [], []>} : vector<8x128xbf16>, vector<128x128xbf16>, vector<8x128xf32> -> vector<8x128xf32>
    %c1_10 = arith.constant 1 : index
    %c0_11 = arith.constant 0 : index
    %14 = vector.load %arg2[%c1_10, %c0_11] : memref<8x128xf32, #tpu.memory_space<vmem>>, vector<1x128xf32>
    %15 = vector.broadcast %14 : vector<1x128xf32> to vector<8x128xf32>
    %16 = arith.addf %13, %15 : vector<8x128xf32>
    %cst_12 = arith.constant 0.000000e+00 : f32
    %17 = vector.broadcast %cst_12 : f32 to vector<8x128xf32>
    %18 = arith.maximumf %16, %17 : vector<8x128xf32>
    %19 = arith.truncf %18 : vector<8x128xf32> to vector<8x128xbf16>
    %c2 = arith.constant 2 : index
    %c0_13 = arith.constant 0 : index
    %c0_14 = arith.constant 0 : index
    %20 = vector.load %arg1[%c2, %c0_13, %c0_14] : memref<4x128x128xbf16, #tpu.memory_space<vmem>>, vector<1x128x128xbf16>
    %21 = vector.shape_cast %20 : vector<1x128x128xbf16> to vector<128x128xbf16>
    %cst_15 = arith.constant dense<0.000000e+00> : vector<8x128xf32>
    %22 = tpu.matmul %19, %21, %cst_15 {dimension_numbers = #tpu.dot_dimension_numbers<[1], [0], [0], [1], [0, 0, 1, 1], [], []>} : vector<8x128xbf16>, vector<128x128xbf16>, vector<8x128xf32> -> vector<8x128xf32>
    %c2_16 = arith.constant 2 : index
    %c0_17 = arith.constant 0 : index
    %23 = vector.load %arg2[%c2_16, %c0_17] : memref<8x128xf32, #tpu.memory_space<vmem>>, vector<1x128xf32>
    %24 = vector.broadcast %23 : vector<1x128xf32> to vector<8x128xf32>
    %25 = arith.addf %22, %24 : vector<8x128xf32>
    %cst_18 = arith.constant 0.000000e+00 : f32
    %26 = vector.broadcast %cst_18 : f32 to vector<8x128xf32>
    %27 = arith.maximumf %25, %26 : vector<8x128xf32>
    %28 = arith.truncf %27 : vector<8x128xf32> to vector<8x128xbf16>
    %c3 = arith.constant 3 : index
    %c0_19 = arith.constant 0 : index
    %c0_20 = arith.constant 0 : index
    %29 = vector.load %arg1[%c3, %c0_19, %c0_20] : memref<4x128x128xbf16, #tpu.memory_space<vmem>>, vector<1x128x128xbf16>
    %30 = vector.shape_cast %29 : vector<1x128x128xbf16> to vector<128x128xbf16>
    %cst_21 = arith.constant dense<0.000000e+00> : vector<8x128xf32>
    %31 = tpu.matmul %28, %30, %cst_21 {dimension_numbers = #tpu.dot_dimension_numbers<[1], [0], [0], [1], [0, 0, 1, 1], [], []>} : vector<8x128xbf16>, vector<128x128xbf16>, vector<8x128xf32> -> vector<8x128xf32>
    %c3_22 = arith.constant 3 : index
    %c0_23 = arith.constant 0 : index
    %32 = vector.load %arg2[%c3_22, %c0_23] : memref<8x128xf32, #tpu.memory_space<vmem>>, vector<1x128xf32>
    %33 = vector.broadcast %32 : vector<1x128xf32> to vector<8x128xf32>
    %34 = arith.addf %31, %33 : vector<8x128xf32>
    %c0_24 = arith.constant 0 : index
    %c0_25 = arith.constant 0 : index
    %35 = vector.load %arg3[%c0_24, %c0_25] : memref<8x128xf32, #tpu.memory_space<vmem>>, vector<8x128xf32>
    tpu.vector_store %arg3[%c0_24, %c0_25], %34 {strides = array<i32>} : memref<8x128xf32, #tpu.memory_space<vmem>>, vector<8x128xf32>,
    return
  }
}

</mosaic_0001>

<bundles_post_ra>
// kernel: tpu_custom_call.1
= control target key start
LH: loop header
LB: loop body
LE: loop exit
PB: predicated region body
PF: predicated region fallthrough
CT: control target
= control target key end

     0   :  { %8 = vsyncpa [#allocation3], 0  ;;  %s826_s0 = inlined_call_operand.hbm [shape: f32[8,16], index: 0, kind: input, shape index: {}]   ;;  %s827_s1 = inlined_call_operand.hbm [shape: bf16[4,128,128], index: 1, kind: input, shape index: {}]   ;;  %s828_s2 = inlined_call_operand.hbm [shape: f32[8,128], index: 2, kind: input, shape index: {}]   ;;  %s829_s3 = inlined_call_operand.hbm [shape: f32[8,128], index: 3, kind: output, shape index: {}]  }
   0x1   :  { %9 = vsyncpa [#allocation6], 0 }
   0x2   :  { %10 = vsyncpa [#allocation4], 0  ;;  %s717_s12 = smov [#allocation5]   ;;  %s623_s16 = scalar_lea.hbm %s827_s1, 4096 }
   0x3   :  { %s26_s13 = sshll.u32 %s717_s12, 4  ;;  %p624_p0 = scmp.ne.s32.totalorder %s827_s1, %s623_s16  ;;  %s27_s13 = int_to_ptr.vmem [resolvable:$true] %s26_s13 }
   0x4   :  { %p627_p1 = scmp.lt.u32.totalorder %s623_s16, %s827_s1 }
   0x6   :  { %p629_p2 = pnand %p627_p1, %p624_p0 }
   0x8   :  { %632 = shalt.err (!%p629_p2)
}
   0x9   :  { %s633_s21 = scalar_lea.vmem %s27_s13, 4096  ;;  %p638_p4 = scmp.lt.s32.totalorder %s27_s13, %s27_s13 }
   0xa   :  { %p634_p3 = scmp.ne.s32.totalorder %s27_s13, %s633_s21  ;;  %p639_p5 = scmp.lt.s32.totalorder %s633_s21, %s633_s21 }
   0xc   :  { %p640_p6 = por %p639_p5, %p638_p4 }
   0xe   :  { %p641_p7 = pnand %p640_p6, %p634_p3 }
  0x10   :  { %644 = shalt.err (!%p641_p7)
}
  0x11   :  { %s718_s22 = smov 64   ;;  %s719_s23 = smov 4  }
  0x12   :  { %32 = dma.hbm_to_vmem [thread:$0]  %s827_s1, 4096, %s27_s13, [#allocation6], %s718_s22, %s718_s22, %s719_s23  }
  0x13   :  { %s720_s26 = smov [#allocation2]   ;;  %s721_s28 = smov [#allocation7]  }
  0x14   :  { %s17_s27 = sshll.u32 %s720_s26, 4  ;;  %s39_s29 = sshll.u32 %s721_s28, 4  ;;  %s18_s27 = int_to_ptr.vmem [resolvable:$true] %s17_s27  ;;  %s40_s29 = int_to_ptr.vmem [resolvable:$true] %s39_s29 }
  0x15   :  { %s645_s5 = scalar_lea.hbm %s826_s0, 128 }
  0x16   :  { %p646_p8 = scmp.ne.s32.totalorder %s826_s0, %s645_s5  ;;  %p649_p9 = scmp.lt.u32.totalorder %s645_s5, %s826_s0 }
  0x18   :  { %p651_p10 = pnand %p649_p9, %p646_p8 }
  0x1a   :  { %654 = shalt.err (!%p651_p10)
}
  0x1b   :  { %s655_s1 = scalar_lea.vmem %s18_s27, 128  ;;  %p660_p12 = scmp.lt.s32.totalorder %s18_s27, %s18_s27 }
  0x1c   :  { %p656_p11 = scmp.ne.s32.totalorder %s18_s27, %s655_s1  ;;  %p661_p13 = scmp.lt.s32.totalorder %s655_s1, %s655_s1 }
  0x1e   :  { %p662_p0 = por %p661_p13, %p660_p12 }
  0x20   :  { %p663_p1 = pnand %p662_p0, %p656_p11 }
  0x22   :  { %666 = shalt.err (!%p663_p1)
}
  0x23   :  { %20 = dma.hbm_to_vmem [thread:$0]  %s826_s0, 128, %s18_s27, [#allocation3]  }
  0x24   :  { %s667_s14 = scalar_lea.hbm %s828_s2, 128 }
  0x25   :  { %p668_p2 = scmp.ne.s32.totalorder %s828_s2, %s667_s14  ;;  %p671_p3 = scmp.lt.u32.totalorder %s667_s14, %s828_s2 }
  0x27   :  { %p673_p4 = pnand %p671_p3, %p668_p2 }
  0x29   :  { %676 = shalt.err (!%p673_p4)
}
  0x2a   :  { %s677_s19 = scalar_lea.vmem %s40_s29, 128  ;;  %p682_p6 = scmp.lt.s32.totalorder %s40_s29, %s40_s29 }
  0x2b   :  { %p678_p5 = scmp.ne.s32.totalorder %s40_s29, %s677_s19  ;;  %p683_p7 = scmp.lt.s32.totalorder %s677_s19, %s677_s19 }
  0x2d   :  { %p684_p8 = por %p683_p7, %p682_p6 }
  0x2f   :  { %p685_p9 = pnand %p684_p8, %p678_p5 }
  0x31   :  { %688 = shalt.err (!%p685_p9)
}
  0x32   :  { %42 = dma.hbm_to_vmem [thread:$0]  %s828_s2, 128, %s40_s29, [#allocation6]  }
  0x33   :  { %711 = dma.done.wait [#allocation3], 128  }
  0x34   :  { %712 = vsyncadd [#allocation3], 4294967168 }
  0x35   :  { %713 = dma.done.wait [#allocation6], 4224  }
  0x36   :  { %714 = vsyncadd [#allocation6], 4294963072  ;;  %v722_v0 = vmov 0.0   ;;  %vm723_vm0 = vmmov 0   ;;  %v598_v1 = vld [vmem:[#allocation5] sm:$0xff]   ;;  %v53_v2 = vld [vmem:[#allocation2] sm:$0xff] }
  0x37   :  { %524 = vmatprep.subr.bf16.mxu0 %v722_v0  ;;  %526 = vmatprep.mubr.msk.bf16.mxu0 %vm723_vm0, %v722_v0  ;;  %v54_v3 = vpack.c.bf16 %v53_v2, %v53_v2  ;;  %vm68_vm1 = vcmask 130048   ;;  %v599_v4 = vld [vmem:[#allocation5 + $0x40] sm:$0xff]   ;;  %v600_v5 = vld [vmem:[#allocation5 + $0x48] sm:$0xff]   ;;  %v601_v6 = vld [vmem:[#allocation5 + $0x50] sm:$0xff]   ;;  %s724_s2 = smov [#allocation8]  }
  0x38   :  { %530 = vmatprep.subr.bf16.mxu1 %v722_v0  ;;  %546 = vmatprep.mubr.msk.bf16.mxu1 %vm723_vm0, %v722_v0  ;;  %v602_v7 = vld [vmem:[#allocation5 + $0x58] sm:$0xff]   ;;  %v603_v8 = vld [vmem:[#allocation5 + $0x60] sm:$0xff]   ;;  %v604_v9 = vld [vmem:[#allocation5 + $0x68] sm:$0xff]   ;;  %s455_s21 = sshll.u32 %s724_s2, 4  ;;  %s456_s21 = int_to_ptr.vmem [resolvable:$true] %s455_s21 }
  0x39   :  { %525 = vmatpush3.bf16.msra.mxu0 %v598_v1  ;;  %531 = vmatpush3.bf16.msra.mxu1 %v599_v4  ;;  %v605_v10 = vld [vmem:[#allocation5 + $0x70] sm:$0xff]   ;;  %v606_v11 = vld [vmem:[#allocation5 + $0x78] sm:$0xff]   ;;  %v607_v12 = vld [vmem:[#allocation5 + $0x80] sm:$0xff]   ;;  %s689_s22 = scalar_lea.vmem %s456_s21, 128  ;;  %p694_p11 = scmp.lt.s32.totalorder %s456_s21, %s456_s21 }
  0x3a   :  { %550 = vmatprep.subr.bf16.mxu0 %v722_v0  ;;  %532 = vmatprep.subr.bf16.mxu1 %v722_v0  ;;  %v608_v13 = vld [vmem:[#allocation5 + $0x88] sm:$0xff]   ;;  %v609_v14 = vld [vmem:[#allocation5 + $0x90] sm:$0xff]   ;;  %v610_v15 = vld [vmem:[#allocation5 + $0x98] sm:$0xff]   ;;  %p690_p10 = scmp.ne.s32.totalorder %s456_s21, %s689_s22  ;;  %p695_p12 = scmp.lt.s32.totalorder %s689_s22, %s689_s22 }
  0x3b   :  { %v611_v16 = vld [vmem:[#allocation5 + $0xa0] sm:$0xff]   ;;  %v612_v17 = vld [vmem:[#allocation5 + $0xa8] sm:$0xff]   ;;  %v613_v26 = vld [vmem:[#allocation5 + $0xb0] sm:$0xff]  }
  0x3c   :  { %527 = vmatmul.mubr.msk.bf16.vlgmr.msra.gmra.mrb[0].mxu0 %vm68_vm1, %v54_v3  ;;  %v465_v18 = vld [vmem:[#allocation7] ss:$0 sm:$0xff]  ;;  %v614_v27 = vld [vmem:[#allocation5 + $0xb8] sm:$0xff]   ;;  %v616_v29 = vld [vmem:[#allocation5 + $0xc8] sm:$0xff]   ;;  %p696_p13 = por %p695_p12, %p694_p11 }
  0x3d   :  { %566 = vmatprep.mubr.msk.bf16.mxu0 %vm723_vm0, %v722_v0  ;;  %533 = vmatpush3.bf16.msra.mxu1 %v600_v5  ;;  %v615_v28 = vld [vmem:[#allocation5 + $0xc0] sm:$0xff]   ;;  %v617_v30 = vld [vmem:[#allocation5 + $0xd0] sm:$0xff]   ;;  %v618_v31 = vld [vmem:[#allocation5 + $0xd8] sm:$0xff]  }
  0x3e   :  { %534 = vmatprep.subr.bf16.mxu1 %v722_v0  ;;  %551 = vmatpush3.bf16.msra.mxu0 %v607_v12  ;;  %v619_v32 = vld [vmem:[#allocation5 + $0xe0] sm:$0xff]   ;;  %v620_v33 = vld [vmem:[#allocation5 + $0xe8] sm:$0xff]   ;;  %v621_v42 = vld [vmem:[#allocation5 + $0xf0] sm:$0xff]   ;;  %p697_p0 = pnand %p696_p13, %p690_p10 }
  0x3f   :  { %552 = vmatprep.subr.bf16.mxu0 %v722_v0  ;;  %v468_v34 = vld [vmem:[#allocation7 + $0x1] ss:$0 sm:$0xff]  ;;  %v622_v43 = vld [vmem:[#allocation5 + $0xf8] sm:$0xff]   ;;  %v477_v44 = vld [vmem:[#allocation7 + $0x2] ss:$0 sm:$0xff] }
  0x40   :  { %v486_v52 = vld [vmem:[#allocation7 + $0x3] ss:$0 sm:$0xff] }
  0x41   :  { %535 = vmatpush3.bf16.msra.mxu1 %v601_v6 }
  0x42   :  { %536 = vmatprep.subr.bf16.mxu1 %v722_v0  ;;  %553 = vmatpush3.bf16.msra.mxu0 %v608_v13 }
  0x43   :  { %554 = vmatprep.subr.bf16.mxu0 %v722_v0 }
  0x45   :  { %537 = vmatpush3.bf16.msra.mxu1 %v602_v7 }
  0x46   :  { %538 = vmatprep.subr.bf16.mxu1 %v722_v0  ;;  %555 = vmatpush3.bf16.msra.mxu0 %v609_v14 }
  0x47   :  { %556 = vmatprep.subr.bf16.mxu0 %v722_v0 }
  0x49   :  { %539 = vmatpush3.bf16.msra.mxu1 %v603_v8 }
  0x4a   :  { %540 = vmatprep.subr.bf16.mxu1 %v722_v0  ;;  %557 = vmatpush3.bf16.msra.mxu0 %v610_v15 }
  0x4b   :  { %558 = vmatprep.subr.bf16.mxu0 %v722_v0 }
  0x4d   :  { %541 = vmatpush3.bf16.msra.mxu1 %v604_v9 }
  0x4e   :  { %542 = vmatprep.subr.bf16.mxu1 %v722_v0  ;;  %559 = vmatpush3.bf16.msra.mxu0 %v611_v16 }
  0x4f   :  { %560 = vmatprep.subr.bf16.mxu0 %v722_v0 }
  0x51   :  { %543 = vmatpush3.bf16.msra.mxu1 %v605_v10 }
  0x52   :  { %544 = vmatprep.subr.bf16.mxu1 %v722_v0  ;;  %561 = vmatpush3.bf16.msra.mxu0 %v612_v17 }
  0x53   :  { %562 = vmatprep.subr.bf16.mxu0 %v722_v0 }
  0x55   :  { %545 = vmatpush3.bf16.msra.mxu1 %v606_v11 }
  0x56   :  { %570 = vmatprep.subr.bf16.mxu1 %v722_v0  ;;  %563 = vmatpush3.bf16.msra.mxu0 %v613_v26 }
  0x57   :  { %564 = vmatprep.subr.bf16.mxu0 %v722_v0 }
  0x5a   :  { %565 = vmatpush3.bf16.msra.mxu0 %v614_v27 }
 0x10f   :  { %v106_v19 = vpop.f32.mrb[0].mxu0 }
 0x110   :  { %v107_v20 = vadd.f32 %v465_v18, %v106_v19  ;;  %v528_v21 = vpop.f32.mrb[1].mxu0 }
 0x111   :  { %v109_v22 = vpop.f32.mrb[2].mxu0 }
 0x112   :  { %v112_v23 = vmax.f32 %v107_v20, 0.0  ;;  %v529_v24 = vpop.f32.mrb[3].mxu0 }
 0x114   :  { %v113_v25 = vpack.c.bf16 %v112_v23, %v112_v23 }
 0x116   :  { %547 = vmatmul.mubr.bf16.vlgmr.msra.gmra.mrb[0].mxu1 %v113_v25 }
 0x117   :  { %586 = vmatprep.mubr.msk.bf16.mxu1 %vm723_vm0, %v722_v0  ;;  %571 = vmatpush3.bf16.msra.mxu1 %v615_v28 }
 0x118   :  { %572 = vmatprep.subr.bf16.mxu1 %v722_v0 }
 0x11b   :  { %573 = vmatpush3.bf16.msra.mxu1 %v616_v29 }
 0x11c   :  { %574 = vmatprep.subr.bf16.mxu1 %v722_v0 }
 0x11f   :  { %575 = vmatpush3.bf16.msra.mxu1 %v617_v30 }
 0x120   :  { %576 = vmatprep.subr.bf16.mxu1 %v722_v0 }
 0x123   :  { %577 = vmatpush3.bf16.msra.mxu1 %v618_v31 }
 0x124   :  { %578 = vmatprep.subr.bf16.mxu1 %v722_v0 }
 0x127   :  { %579 = vmatpush3.bf16.msra.mxu1 %v619_v32 }
 0x128   :  { %580 = vmatprep.subr.bf16.mxu1 %v722_v0 }
 0x12b   :  { %581 = vmatpush3.bf16.msra.mxu1 %v620_v33 }
 0x12c   :  { %582 = vmatprep.subr.bf16.mxu1 %v722_v0 }
 0x12f   :  { %583 = vmatpush3.bf16.msra.mxu1 %v621_v42 }
 0x130   :  { %584 = vmatprep.subr.bf16.mxu1 %v722_v0 }
 0x133   :  { %585 = vmatpush3.bf16.msra.mxu1 %v622_v43 }
 0x1e9   :  { %v218_v35 = vpop.f32.mrb[0].mxu1 }
 0x1ea   :  { %v219_v36 = vadd.f32 %v468_v34, %v218_v35  ;;  %v548_v37 = vpop.f32.mrb[1].mxu1 }
 0x1eb   :  { %v221_v38 = vpop.f32.mrb[2].mxu1 }
 0x1ec   :  { %v224_v39 = vmax.f32 %v219_v36, 0.0  ;;  %v549_v40 = vpop.f32.mrb[3].mxu1 }
 0x1ee   :  { %v225_v41 = vpack.c.bf16 %v224_v39, %v224_v39 }
 0x1f0   :  { %567 = vmatmul.mubr.bf16.vlgmr.msra.gmra.mrb[4].mxu0 %v225_v41 }
 0x2c3   :  { %v330_v45 = vpop.f32.mrb[4].mxu0 }
 0x2c4   :  { %v331_v46 = vadd.f32 %v477_v44, %v330_v45  ;;  %v568_v47 = vpop.f32.mrb[5].mxu0 }
 0x2c5   :  { %v333_v48 = vpop.f32.mrb[6].mxu0 }
 0x2c6   :  { %v336_v49 = vmax.f32 %v331_v46, 0.0  ;;  %v569_v50 = vpop.f32.mrb[7].mxu0 }
 0x2c8   :  { %v337_v51 = vpack.c.bf16 %v336_v49, %v336_v49 }
 0x2ca   :  { %587 = vmatmul.mubr.bf16.vlgmr.msra.gmra.mrb[4].mxu1 %v337_v51 }
 0x39d   :  { %v442_v53 = vpop.f32.mrb[4].mxu1 }
 0x39e   :  { %v443_v54 = vadd.f32 %v486_v52, %v442_v53  ;;  %v588_v55 = vpop.f32.mrb[5].mxu1 }
 0x39f   :  { %v445_v56 = vpop.f32.mrb[6].mxu1 }
 0x3a0   :  { %448 = vst [vmem:[#allocation8] sm:$0xff] %v443_v54  ;;  %v589_v57 = vpop.f32.mrb[7].mxu1 }
 0x3a1   :  { %700 = shalt.err (!%p697_p0)
}
 0x3a2   :  { %s701_s25 = scalar_lea.hbm %s829_s3, 128 }
 0x3a3   :  { %p702_p1 = scmp.ne.s32.totalorder %s829_s3, %s701_s25  ;;  %p705_p2 = scmp.lt.u32.totalorder %s701_s25, %s829_s3 }
 0x3a5   :  { %p707_p3 = pnand %p705_p2, %p702_p1 }
 0x3a7   :  { %710 = shalt.err (!%p707_p3)
}
 0x3a8   :  { %458 = dma.vmem_to_hbm [thread:$0]  %s456_s21, 128, %s829_s3, [#allocation4]  }
 0x3a9   :  { %715 = dma.done.wait [#allocation4], 128  }
 0x3aa   :  { %716 = vsyncadd [#allocation4], 4294967168 }
 0x3ab   :  { %462 = vsyncpa [#allocation3], 1 }
 0x3ac   :  { %463 = vsyncpa [#allocation6], 1 }
 0x3ad   :  { %464 = vsyncpa [#allocation4], 1 }

</bundles_post_ra>
